<compile_context>
chip_gen: v7x
topology: tpu7x:2x2x1
jax: 0.10.0
libtpu: 0.0.40
codegen_flags: <defaults>
</compile_context>

<pallas_src>
import functools

import jax
import jax.numpy as jnp
import numpy as np
from jax.experimental import pallas as pl
from jax.experimental.pallas import tpu as pltpu

BN_EPS = 1e-5
_TM_STEP = 16  # bf16 sublane tile is (16, 128); keep TM a multiple of it.


def _round_up(x, m):
    return (x + m - 1) // m * m


# --------------------------- chip-aware tiling helpers ---------------------------
def _chip_traits():
    """Return (vmem_budget_bytes, mxu_lane_align) for the local TPU generation."""
    kind = ""
    try:
        kind = jax.devices()[0].device_kind.lower()
    except Exception:
        pass
    vmem_phys = None
    try:
        vmem_phys = int(getattr(pltpu.get_tpu_info(), "vmem_capacity_bytes", 0)) or None
    except Exception:
        vmem_phys = None
    if vmem_phys is None:
        # v5e/v5p/v6e: 128 MiB physical VMEM; v7x: 64 MiB.  Conservative default.
        vmem_phys = (128 << 20) if ("v5" in kind or "v6" in kind) else (64 << 20)
    budget = int(vmem_phys * 3 // 4)  # leave headroom under the physical cap
    mxu = 128 if any(g in kind for g in ("v2", "v3", "v4", "v5")) else 256
    return budget, mxu


def _pad_dim(d, mxu):
    """Lane-dense padding: 128-aligned, 256-aligned on 256x256-MXU chips if cheap."""
    if mxu >= 256 and d >= 256:
        p256 = _round_up(d, 256)
        if p256 - d <= d // 8:
            return p256
    return _round_up(d, 128)


def _tile_bytes(tm, K_pad, C_pad):
    """Worst-case per-grid-step VMEM footprint (bytes) across pass 1 / pass 2."""
    # pass 1: double-buffered bf16 patch + bf16 out + f32 stats tiles, plus the
    # resident (double-buffered) bf16 weight block.
    p1 = 2 * (tm * K_pad * 2 + tm * C_pad * 2 + 2 * C_pad * 4) + 2 * K_pad * C_pad * 2
    # pass 2: double-buffered bf16 y + bf16 residual + f32 out tiles (+ vectors).
    p2 = 2 * (tm * C_pad * (2 + 2 + 4) + 6 * C_pad * 4)
    return max(p1, p2) + (2 << 20)  # slack for compiler-internal scratch


def _choose_tm(M, K_pad, C_pad, vmem_budget, tile_cap=1024):
    """Largest TM (multiple of 16) that fits the VMEM budget, keeps >=2 grid
    tiles when possible, and preferably divides M (no row-padding needed)."""
    M_r = _round_up(max(M, 1), _TM_STEP)

    def fits(t):
        return _tile_bytes(t, K_pad, C_pad) <= vmem_budget

    hi = min(tile_cap, M_r)
    if M_r >= 2 * _TM_STEP:  # keep at least 2 grid tiles (pipelining / megacore)
        hi = min(hi, _round_up(M_r // 2, _TM_STEP))
    hi = max(_TM_STEP, hi - hi % _TM_STEP)
    t = hi
    while t > _TM_STEP and not fits(t):
        t -= _TM_STEP
    # snap to a nearby divisor of M_r to avoid padding rows up to M_pad.
    d = t
    while d >= max(_TM_STEP, t - 16 * _TM_STEP):
        if M_r % d == 0 and fits(d):
            return d
        d -= _TM_STEP
    return t


# --------------------------- Pallas kernels ---------------------------
def _conv_stats_kernel(p_ref, w_ref, y_ref, stats_ref):
    """bf16 x bf16 -> f32 matmul tile; bf16 store + per-channel sum / sumsq (f32)."""
    y = jnp.dot(p_ref[...], w_ref[...], preferred_element_type=jnp.float32)
    y_ref[...] = y.astype(y_ref.dtype)                        # bf16 intermediate
    s = jnp.sum(y, axis=0, keepdims=True)                     # (1, C_pad)
    ss = jnp.sum(y * y, axis=0, keepdims=True)                # (1, C_pad)
    stats_ref[...] = jnp.concatenate([s, ss], axis=0)[None]   # (1, 2, C_pad)


def _make_norm_kernel(apply_relu, residual_mode):
    """out = y*scale + shift  [+ residual | + residual*rscale + rshift]  [-> ReLU]."""

    def kernel(*refs):
        if residual_mode == "affine":
            y_ref, sc_ref, sh_ref, r_ref, rsc_ref, rsh_ref, o_ref = refs
        elif residual_mode == "raw":
            y_ref, sc_ref, sh_ref, r_ref, o_ref = refs
        else:
            y_ref, sc_ref, sh_ref, o_ref = refs
        out = y_ref[...].astype(jnp.float32) * sc_ref[...] + sh_ref[...]
        if residual_mode == "affine":
            out = out + (r_ref[...].astype(jnp.float32) * rsc_ref[...] + rsh_ref[...])
        elif residual_mode == "raw":
            out = out + r_ref[...].astype(jnp.float32)
        if apply_relu:
            out = jnp.maximum(out, 0.0)
        o_ref[...] = out.astype(o_ref.dtype)

    return kernel


# --------------------------- conv pass 1 (matmul + stats) ---------------------------
def _conv_pass1(x_nhwc, w_oihw, *, stride, padding, vmem_budget, mxu, tm_override=None):
    """Conv2d(bias=False) as an im2col matmul.  Returns the raw conv output
    (bf16, (M_pad, C_pad)), per-tile channel stats, and the tiling metadata."""
    N, H, W, Cin = x_nhwc.shape
    Cout, Cin_w, KH, KW = w_oihw.shape
    assert Cin == Cin_w
    Ho = (H + 2 * padding - KH) // stride + 1
    Wo = (W + 2 * padding - KW) // stride + 1
    M = N * Ho * Wo
    K = KH * KW * Cin
    K_pad = _pad_dim(K, mxu)
    C_pad = _pad_dim(Cout, mxu)

    TM = tm_override if tm_override is not None else _choose_tm(M, K_pad, C_pad, vmem_budget)
    M_pad = _round_up(M, TM)
    num_tiles = M_pad // TM

    # --- glue: zero-pad + im2col (bf16; strided slices, single concatenate) ---
    # TODO(synk): move patch assembly inside pass 1 (overlapping VMEM windows of x)
    #             to avoid the KH*KW-duplicated HBM patch matrix.
    xp = x_nhwc.astype(jnp.bfloat16)
    if padding:
        xp = jnp.pad(xp, ((0, 0), (padding, padding), (padding, padding), (0, 0)))
    cols = [xp[:, kh:kh + Ho * stride:stride, kw:kw + Wo * stride:stride, :]
            for kh in range(KH) for kw in range(KW)]
    if K_pad > K:  # fold lane padding into the same concatenate (no extra pad pass)
        cols.append(jnp.zeros((N, Ho, Wo, K_pad - K), jnp.bfloat16))
    patches = jnp.concatenate(cols, axis=-1).reshape(M, K_pad)
    if M_pad > M:  # only when no divisor-of-M tile was available
        patches = jnp.pad(patches, ((0, M_pad - M), (0, 0)))

    wmat = jnp.transpose(w_oihw, (2, 3, 1, 0)).reshape(K, Cout).astype(jnp.bfloat16)
    wmat = jnp.pad(wmat, ((0, K_pad - K), (0, C_pad - Cout)))

    # NOTE: the resident weight block keeps Pallas' default double buffering; its
    # 2x footprint is charged in _tile_bytes so large layers shrink TM instead of
    # overflowing VMEM (single-buffering it is a further K_pad*C_pad*2-byte win).
    y, stats = pl.pallas_call(
        _conv_stats_kernel,
        out_shape=(jax.ShapeDtypeStruct((M_pad, C_pad), jnp.bfloat16),
                   jax.ShapeDtypeStruct((num_tiles, 2, C_pad), jnp.float32)),
        grid=(num_tiles,),
        in_specs=[pl.BlockSpec((TM, K_pad), lambda i: (i, 0)),
                  pl.BlockSpec((K_pad, C_pad), lambda i: (0, 0))],
        out_specs=(pl.BlockSpec((TM, C_pad), lambda i: (i, 0)),
                   pl.BlockSpec((1, 2, C_pad), lambda i: (i, 0, 0))),
        compiler_params=pltpu.CompilerParams(
            dimension_semantics=("parallel",), vmem_limit_bytes=vmem_budget),
    )(patches, wmat)

    meta = dict(N=N, M=M, M_pad=M_pad, TM=TM, num_tiles=num_tiles,
                C_pad=C_pad, Ho=Ho, Wo=Wo, Cout=Cout)
    return y, stats, meta


def _bn_scale_shift(stats, M, Cout, C_pad, gamma, beta):
    """Tiny JAX reduce: global batch stats, gamma/beta folded into scale/shift."""
    ch_sum = jnp.sum(stats[:, 0, :], axis=0)
    ch_sq = jnp.sum(stats[:, 1, :], axis=0)
    mean = ch_sum / M
    # NOTE: E[x^2] - E[x]^2 in f32; adequate for these activation magnitudes.
    var = jnp.maximum(ch_sq / M - mean * mean, 0.0)
    g = jnp.pad(gamma.astype(jnp.float32), (0, C_pad - Cout))
    b = jnp.pad(beta.astype(jnp.float32), (0, C_pad - Cout))
    scale = g * jax.lax.rsqrt(var + BN_EPS)
    shift = b - mean * scale
    return scale.reshape(1, C_pad), shift.reshape(1, C_pad)


def _norm_pass2(y, scale, shift, *, TM, relu, out_dtype, vmem_budget,
                residual=None, res_scale=None, res_shift=None):
    """Tiled elementwise normalize (+ residual, optionally with its own BN affine)."""
    M_pad, C_pad = y.shape
    num_tiles = M_pad // TM
    mode = None
    inputs = [y, scale, shift]
    in_specs = [pl.BlockSpec((TM, C_pad), lambda i: (i, 0)),
                pl.BlockSpec((1, C_pad), lambda i: (0, 0)),
                pl.BlockSpec((1, C_pad), lambda i: (0, 0))]
    if residual is not None:
        inputs.append(residual)
        in_specs.append(pl.BlockSpec((TM, C_pad), lambda i: (i, 0)))
        if res_scale is not None:
            mode = "affine"
            inputs += [res_scale, res_shift]
            in_specs += [pl.BlockSpec((1, C_pad), lambda i: (0, 0)),
                         pl.BlockSpec((1, C_pad), lambda i: (0, 0))]
        else:
            mode = "raw"
    return pl.pallas_call(
        _make_norm_kernel(apply_relu=relu, residual_mode=mode),
        out_shape=jax.ShapeDtypeStruct((M_pad, C_pad), out_dtype),
        grid=(num_tiles,),
        in_specs=in_specs,
        out_specs=pl.BlockSpec((TM, C_pad), lambda i: (i, 0)),
        compiler_params=pltpu.CompilerParams(
            dimension_semantics=("parallel",), vmem_limit_bytes=vmem_budget),
    )(*inputs)


def conv_bn_act(x_nhwc, w, gamma, beta, *, stride, padding, relu, out_dtype,
                vmem_budget, mxu):
    """Conv2d(bias=False) + BatchNorm2d(batch stats) [+ ReLU]."""
    y, stats, m = _conv_pass1(x_nhwc, w, stride=stride, padding=padding,
                              vmem_budget=vmem_budget, mxu=mxu)
    scale, shift = _bn_scale_shift(stats, m["M"], m["Cout"], m["C_pad"], gamma, beta)
    out = _norm_pass2(y, scale, shift, TM=m["TM"], relu=relu, out_dtype=out_dtype,
                      vmem_budget=vmem_budget)
    return out[:m["M"], :m["Cout"]].reshape(m["N"], m["Ho"], m["Wo"], m["Cout"])


# --------------------------- Resnet_bloc forward ---------------------------
def resnet_bloc_forward(x_nchw, params, *, stride, conv_in_identity):
    """Forward of Resnet_bloc.  Input/output layout: NCHW (PyTorch convention)."""
    vmem_budget, mxu = _chip_traits()
    x = jnp.transpose(x_nchw, (0, 2, 3, 1))  # NCHW -> NHWC

    # seq: conv1(stride, pad=1) -> BN -> ReLU   (inter-layer activation kept bf16)
    y1 = conv_bn_act(x, params["w1"], params["g1"], params["b1"],
                     stride=stride, padding=1, relu=True, out_dtype=jnp.bfloat16,
                     vmem_budget=vmem_budget, mxu=mxu)

    # seq: conv2(stride=1, pad=1) -> pass 1 only (matmul + BN stats).
    y2, st2, m2 = _conv_pass1(y1, params["w2"], stride=1, padding=1,
                              vmem_budget=vmem_budget, mxu=mxu)
    sc2, sh2 = _bn_scale_shift(st2, m2["M"], m2["Cout"], m2["C_pad"],
                               params["g2"], params["b2"])

    # seq_identity: its BatchNorm is folded into the final normalize kernel.
    if conv_in_identity:
        y_id, st_id, m_id = _conv_pass1(x, params["w_id"], stride=2, padding=0,
                                        vmem_budget=vmem_budget, mxu=mxu,
                                        tm_override=m2["TM"])
        assert m_id["M_pad"] == m2["M_pad"] and m_id["C_pad"] == m2["C_pad"]
        sc_id, sh_id = _bn_scale_shift(st_id, m_id["M"], m_id["Cout"], m_id["C_pad"],
                                       params["g_id"], params["b_id"])
        residual, res_scale, res_shift = y_id, sc_id, sh_id
    else:
        res = x.astype(jnp.bfloat16).reshape(m2["M"], x.shape[-1])
        res = jnp.pad(res, ((0, m2["M_pad"] - m2["M"]),
                            (0, m2["C_pad"] - x.shape[-1])))
        residual, res_scale, res_shift = res, None, None

    # Final fused pass: bn2(y2) + [bn_id(y_id) | x] -> ReLU, f32 output.
    out = _norm_pass2(y2, sc2, sh2, TM=m2["TM"], relu=True, out_dtype=jnp.float32,
                      vmem_budget=vmem_budget, residual=residual,
                      res_scale=res_scale, res_shift=res_shift)
    out = out[:m2["M"], :m2["Cout"]].reshape(m2["N"], m2["Ho"], m2["Wo"], m2["Cout"])
    return jnp.transpose(out, (0, 3, 1, 2))  # NHWC -> NCHW


# ----------------------- pure-JAX reference for validation -----------------------
def _ref_conv_bn(x_nhwc, w_oihw, gamma, beta, *, stride, padding, relu, residual=None):
    y = jax.lax.conv_general_dilated(
        x_nhwc, jnp.transpose(w_oihw, (2, 3, 1, 0)),
        window_strides=(stride, stride), padding=[(padding, padding)] * 2,
        dimension_numbers=("NHWC", "HWIO", "NHWC"))
    mean = jnp.mean(y, axis=(0, 1, 2), keepdims=True)
    var = jnp.mean((y - mean) ** 2, axis=(0, 1, 2), keepdims=True)
    y = gamma * (y - mean) * jax.lax.rsqrt(var + BN_EPS) + beta
    if residual is not None:
        y = y + residual
    if relu:
        y = jnp.maximum(y, 0.0)
    return y


def _ref_forward(x_nchw, params, *, stride, conv_in_identity):
    x = jnp.transpose(x_nchw, (0, 2, 3, 1))
    y1 = _ref_conv_bn(x, params["w1"], params["g1"], params["b1"],
                      stride=stride, padding=1, relu=True)
    if conv_in_identity:
        y_id = _ref_conv_bn(x, params["w_id"], params["g_id"], params["b_id"],
                            stride=2, padding=0, relu=False)
    else:
        y_id = x
    out = _ref_conv_bn(y1, params["w2"], params["g2"], params["b2"],
                       stride=1, padding=1, relu=True, residual=y_id)
    return jnp.transpose(out, (0, 3, 1, 2))


if __name__ == "__main__":
    key = jax.random.PRNGKey(0)
    k1, k2, k3, kx, k4, k5, ky = jax.random.split(key, 7)

    # ---- config 1: downsampling block (stride 2, 1x1 conv in identity path) ----
    N, Cin, H, W = 2, 4, 16, 16
    Cout, ks, stride = 8, 3, 2
    params = {
        # Conv_bnn posterior-mean weights (deterministic, no sampling).
        "w1": 0.1 * jax.random.normal(k1, (Cout, Cin, ks, ks), jnp.float32),
        "w2": 0.1 * jax.random.normal(k2, (Cout, Cout, ks, ks), jnp.float32),
        "w_id": 0.1 * jax.random.normal(k3, (Cout, Cin, 1, 1), jnp.float32),
        # BatchNorm2d default init: weight=1, bias=0.
        "g1": jnp.ones((Cout,), jnp.float32), "b1": jnp.zeros((Cout,), jnp.float32),
        "g2": jnp.ones((Cout,), jnp.float32), "b2": jnp.zeros((Cout,), jnp.float32),
        "g_id": jnp.ones((Cout,), jnp.float32), "b_id": jnp.zeros((Cout,), jnp.float32),
    }
    x = jax.random.normal(kx, (N, Cin, H, W), jnp.float32)

    fwd = jax.jit(functools.partial(resnet_bloc_forward, stride=stride,
                                    conv_in_identity=True))
    out = jax.block_until_ready(fwd(x, params))
    ref = _ref_forward(x, params, stride=stride, conv_in_identity=True)
    # bf16 MXU operands + bf16 intermediates vs an all-f32 reference.
    np.testing.assert_allclose(np.asarray(out, np.float32), np.asarray(ref, np.float32),
                               rtol=5e-2, atol=5e-2)
    assert out.shape == (N, Cout, H // 2, W // 2)

    # ---- config 2: identity-passthrough block (stride 1, Cin == Cout) ----
    C2 = 8
    params2 = {
        "w1": 0.1 * jax.random.normal(k4, (C2, C2, ks, ks), jnp.float32),
        "w2": 0.1 * jax.random.normal(k5, (C2, C2, ks, ks), jnp.float32),
        "g1": jnp.ones((C2,), jnp.float32), "b1": jnp.zeros((C2,), jnp.float32),
        "g2": jnp.ones((C2,), jnp.float32), "b2": jnp.zeros((C2,), jnp.float32),
    }
    x2 = jax.random.normal(ky, (N, C2, H, W), jnp.float32)
    fwd2 = jax.jit(functools.partial(resnet_bloc_forward, stride=1,
                                     conv_in_identity=False))
    out2 = jax.block_until_ready(fwd2(x2, params2))
    ref2 = _ref_forward(x2, params2, stride=1, conv_in_identity=False)
    np.testing.assert_allclose(np.asarray(out2, np.float32), np.asarray(ref2, np.float32),
                               rtol=5e-2, atol=5e-2)
    assert out2.shape == (N, C2, H, W)

    print("KERNEL_OK")
</pallas_src>

<mosaic_0001>
module attributes {stable_mosaic.version = 11 : i64} {
  func.func @_conv_stats_kernel(%arg0: i32, %arg1: memref<64x128xbf16, #tpu.memory_space<vmem>>, %arg2: memref<128x128xbf16, #tpu.memory_space<vmem>>, %arg3: memref<64x128xbf16, #tpu.memory_space<vmem>>, %arg4: memref<1x2x128xf32, #tpu.memory_space<vmem>>) attributes {dimension_semantics = [#tpu.dimension_semantics<parallel>], iteration_bounds = array<i64: 2>, scalar_prefetch = 0 : i64, scratch_operands = 0 : i64, tpu.core_type = #tpu.core_type<tc>, window_params = [{transform_indices = @transform_0, window_bounds = array<i64: 64, 128>}, {pipeline_mode = #tpu.pipeline_mode<synchronous>, transform_indices = @transform_1, window_bounds = array<i64: 128, 128>}, {transform_indices = @transform_2, window_bounds = array<i64: 64, 128>}, {transform_indices = @transform_3, window_bounds = array<i64: 1, 2, 128>}]} {
    %c0 = arith.constant 0 : index
    %c0_0 = arith.constant 0 : index
    %0 = vector.load %arg1[%c0, %c0_0] : memref<64x128xbf16, #tpu.memory_space<vmem>>, vector<64x128xbf16>
    %c0_1 = arith.constant 0 : index
    %c0_2 = arith.constant 0 : index
    %1 = vector.load %arg2[%c0_1, %c0_2] : memref<128x128xbf16, #tpu.memory_space<vmem>>, vector<128x128xbf16>
    %cst = arith.constant dense<0.000000e+00> : vector<64x128xf32>
    %2 = tpu.matmul %0, %1, %cst {dimension_numbers = #tpu.dot_dimension_numbers<[1], [0], [0], [1], [0, 0, 1, 1], [], []>} : vector<64x128xbf16>, vector<128x128xbf16>, vector<64x128xf32> -> vector<64x128xf32>
    %3 = arith.truncf %2 : vector<64x128xf32> to vector<64x128xbf16>
    %c0_3 = arith.constant 0 : index
    %c0_4 = arith.constant 0 : index
    %4 = vector.load %arg3[%c0_3, %c0_4] : memref<64x128xbf16, #tpu.memory_space<vmem>>, vector<64x128xbf16>
    tpu.vector_store %arg3[%c0_3, %c0_4], %3 {strides = array<i32>} : memref<64x128xbf16, #tpu.memory_space<vmem>>, vector<64x128xbf16>,
    %cst_5 = arith.constant dense<0.000000e+00> : vector<128xf32>
    %5 = vector.multi_reduction <add>, %2, %cst_5 [0] : vector<64x128xf32> to vector<128xf32>
    %6 = vector.shape_cast %5 : vector<128xf32> to vector<1x128xf32>
    %7 = arith.mulf %2, %2 : vector<64x128xf32>
    %cst_6 = arith.constant dense<0.000000e+00> : vector<128xf32>
    %8 = vector.multi_reduction <add>, %7, %cst_6 [0] : vector<64x128xf32> to vector<128xf32>
    %9 = vector.shape_cast %8 : vector<128xf32> to vector<1x128xf32>
    %10 = tpu.concatenate %6, %9 in 0 : vector<1x128xf32>, vector<1x128xf32> -> vector<2x128xf32>
    %11 = vector.shape_cast %10 : vector<2x128xf32> to vector<1x2x128xf32>
    %c0_7 = arith.constant 0 : index
    %c0_8 = arith.constant 0 : index
    %c0_9 = arith.constant 0 : index
    %12 = vector.load %arg4[%c0_7, %c0_8, %c0_9] : memref<1x2x128xf32, #tpu.memory_space<vmem>>, vector<1x2x128xf32>
    tpu.vector_store %arg4[%c0_7, %c0_8, %c0_9], %11 {strides = array<i32>} : memref<1x2x128xf32, #tpu.memory_space<vmem>>, vector<1x2x128xf32>,
    return
  }
  func.func @transform_0(%arg0: i32) -> (i32, i32) {
    %c0_i32 = arith.constant 0 : i32
    %c0_i32_0 = arith.constant 0 : i32
    return %arg0, %c0_i32 : i32, i32
  }
  func.func @transform_1(%arg0: i32) -> (i32, i32) {
    %c0_i32 = arith.constant 0 : i32
    %c0_i32_0 = arith.constant 0 : i32
    %c0_i32_1 = arith.constant 0 : i32
    return %c0_i32, %c0_i32_0 : i32, i32
  }
  func.func @transform_2(%arg0: i32) -> (i32, i32) {
    %c0_i32 = arith.constant 0 : i32
    %c0_i32_0 = arith.constant 0 : i32
    return %arg0, %c0_i32 : i32, i32
  }
  func.func @transform_3(%arg0: i32) -> (i32, i32, i32) {
    %c0_i32 = arith.constant 0 : i32
    %c0_i32_0 = arith.constant 0 : i32
    %c0_i32_1 = arith.constant 0 : i32
    return %arg0, %c0_i32, %c0_i32_0 : i32, i32, i32
  }
}

module attributes {stable_mosaic.version = 11 : i64} {
  func.func @kernel(%arg0: i32, %arg1: memref<64x128xbf16, #tpu.memory_space<vmem>>, %arg2: memref<1x128xf32, #tpu.memory_space<vmem>>, %arg3: memref<1x128xf32, #tpu.memory_space<vmem>>, %arg4: memref<64x128xbf16, #tpu.memory_space<vmem>>) attributes {dimension_semantics = [#tpu.dimension_semantics<parallel>], iteration_bounds = array<i64: 2>, scalar_prefetch = 0 : i64, scratch_operands = 0 : i64, tpu.core_type = #tpu.core_type<tc>, window_params = [{transform_indices = @transform_0, window_bounds = array<i64: 64, 128>}, {pipeline_mode = #tpu.pipeline_mode<synchronous>, transform_indices = @transform_1, window_bounds = array<i64: 1, 128>}, {pipeline_mode = #tpu.pipeline_mode<synchronous>, transform_indices = @transform_2, window_bounds = array<i64: 1, 128>}, {transform_indices = @transform_3, window_bounds = array<i64: 64, 128>}]} {
    %c0 = arith.constant 0 : index
    %c0_0 = arith.constant 0 : index
    %0 = vector.load %arg1[%c0, %c0_0] : memref<64x128xbf16, #tpu.memory_space<vmem>>, vector<64x128xbf16>
    %1 = arith.extf %0 : vector<64x128xbf16> to vector<64x128xf32>
    %c0_1 = arith.constant 0 : index
    %c0_2 = arith.constant 0 : index
    %2 = vector.load %arg2[%c0_1, %c0_2] : memref<1x128xf32, #tpu.memory_space<vmem>>, vector<1x128xf32>
    %3 = vector.broadcast %2 : vector<1x128xf32> to vector<64x128xf32>
    %4 = arith.mulf %1, %3 : vector<64x128xf32>
    %c0_3 = arith.constant 0 : index
    %c0_4 = arith.constant 0 : index
    %5 = vector.load %arg3[%c0_3, %c0_4] : memref<1x128xf32, #tpu.memory_space<vmem>>, vector<1x128xf32>
    %6 = vector.broadcast %5 : vector<1x128xf32> to vector<64x128xf32>
    %7 = arith.addf %4, %6 : vector<64x128xf32>
    %cst = arith.constant 0.000000e+00 : f32
    %8 = vector.broadcast %cst : f32 to vector<64x128xf32>
    %9 = arith.maximumf %7, %8 : vector<64x128xf32>
    %10 = arith.truncf %9 : vector<64x128xf32> to vector<64x128xbf16>
    %c0_5 = arith.constant 0 : index
    %c0_6 = arith.constant 0 : index
    %11 = vector.load %arg4[%c0_5, %c0_6] : memref<64x128xbf16, #tpu.memory_space<vmem>>, vector<64x128xbf16>
    tpu.vector_store %arg4[%c0_5, %c0_6], %10 {strides = array<i32>} : memref<64x128xbf16, #tpu.memory_space<vmem>>, vector<64x128xbf16>,
    return
  }
  func.func @transform_0(%arg0: i32) -> (i32, i32) {
    %c0_i32 = arith.constant 0 : i32
    %c0_i32_0 = arith.constant 0 : i32
    return %arg0, %c0_i32 : i32, i32
  }
  func.func @transform_1(%arg0: i32) -> (i32, i32) {
    %c0_i32 = arith.constant 0 : i32
    %c0_i32_0 = arith.constant 0 : i32
    %c0_i32_1 = arith.constant 0 : i32
    return %c0_i32, %c0_i32_0 : i32, i32
  }
  func.func @transform_2(%arg0: i32) -> (i32, i32) {
    %c0_i32 = arith.constant 0 : i32
    %c0_i32_0 = arith.constant 0 : i32
    %c0_i32_1 = arith.constant 0 : i32
    return %c0_i32, %c0_i32_0 : i32, i32
  }
  func.func @transform_3(%arg0: i32) -> (i32, i32) {
    %c0_i32 = arith.constant 0 : i32
    %c0_i32_0 = arith.constant 0 : i32
    return %arg0, %c0_i32 : i32, i32
  }
}

module attributes {stable_mosaic.version = 11 : i64} {
  func.func @kernel(%arg0: i32, %arg1: memref<64x128xbf16, #tpu.memory_space<vmem>>, %arg2: memref<1x128xf32, #tpu.memory_space<vmem>>, %arg3: memref<1x128xf32, #tpu.memory_space<vmem>>, %arg4: memref<64x128xbf16, #tpu.memory_space<vmem>>, %arg5: memref<1x128xf32, #tpu.memory_space<vmem>>, %arg6: memref<1x128xf32, #tpu.memory_space<vmem>>, %arg7: memref<64x128xf32, #tpu.memory_space<vmem>>) attributes {dimension_semantics = [#tpu.dimension_semantics<parallel>], iteration_bounds = array<i64: 2>, scalar_prefetch = 0 : i64, scratch_operands = 0 : i64, tpu.core_type = #tpu.core_type<tc>, window_params = [{transform_indices = @transform_0, window_bounds = array<i64: 64, 128>}, {pipeline_mode = #tpu.pipeline_mode<synchronous>, transform_indices = @transform_1, window_bounds = array<i64: 1, 128>}, {pipeline_mode = #tpu.pipeline_mode<synchronous>, transform_indices = @transform_2, window_bounds = array<i64: 1, 128>}, {transform_indices = @transform_3, window_bounds = array<i64: 64, 128>}, {pipeline_mode = #tpu.pipeline_mode<synchronous>, transform_indices = @transform_4, window_bounds = array<i64: 1, 128>}, {pipeline_mode = #tpu.pipeline_mode<synchronous>, transform_indices = @transform_5, window_bounds = array<i64: 1, 128>}, {transform_indices = @transform_6, window_bounds = array<i64: 64, 128>}]} {
    %c0 = arith.constant 0 : index
    %c0_0 = arith.constant 0 : index
    %0 = vector.load %arg1[%c0, %c0_0] : memref<64x128xbf16, #tpu.memory_space<vmem>>, vector<64x128xbf16>
    %1 = arith.extf %0 : vector<64x128xbf16> to vector<64x128xf32>
    %c0_1 = arith.constant 0 : index
    %c0_2 = arith.constant 0 : index
    %2 = vector.load %arg2[%c0_1, %c0_2] : memref<1x128xf32, #tpu.memory_space<vmem>>, vector<1x128xf32>
    %3 = vector.broadcast %2 : vector<1x128xf32> to vector<64x128xf32>
    %4 = arith.mulf %1, %3 : vector<64x128xf32>
    %c0_3 = arith.constant 0 : index
    %c0_4 = arith.constant 0 : index
    %5 = vector.load %arg3[%c0_3, %c0_4] : memref<1x128xf32, #tpu.memory_space<vmem>>, vector<1x128xf32>
    %6 = vector.broadcast %5 : vector<1x128xf32> to vector<64x128xf32>
    %7 = arith.addf %4, %6 : vector<64x128xf32>
    %c0_5 = arith.constant 0 : index
    %c0_6 = arith.constant 0 : index
    %8 = vector.load %arg4[%c0_5, %c0_6] : memref<64x128xbf16, #tpu.memory_space<vmem>>, vector<64x128xbf16>
    %9 = arith.extf %8 : vector<64x128xbf16> to vector<64x128xf32>
    %c0_7 = arith.constant 0 : index
    %c0_8 = arith.constant 0 : index
    %10 = vector.load %arg5[%c0_7, %c0_8] : memref<1x128xf32, #tpu.memory_space<vmem>>, vector<1x128xf32>
    %11 = vector.broadcast %10 : vector<1x128xf32> to vector<64x128xf32>
    %12 = arith.mulf %9, %11 : vector<64x128xf32>
    %c0_9 = arith.constant 0 : index
    %c0_10 = arith.constant 0 : index
    %13 = vector.load %arg6[%c0_9, %c0_10] : memref<1x128xf32, #tpu.memory_space<vmem>>, vector<1x128xf32>
    %14 = vector.broadcast %13 : vector<1x128xf32> to vector<64x128xf32>
    %15 = arith.addf %12, %14 : vector<64x128xf32>
    %16 = arith.addf %7, %15 : vector<64x128xf32>
    %cst = arith.constant 0.000000e+00 : f32
    %17 = vector.broadcast %cst : f32 to vector<64x128xf32>
    %18 = arith.maximumf %16, %17 : vector<64x128xf32>
    %c0_11 = arith.constant 0 : index
    %c0_12 = arith.constant 0 : index
    %19 = vector.load %arg7[%c0_11, %c0_12] : memref<64x128xf32, #tpu.memory_space<vmem>>, vector<64x128xf32>
    tpu.vector_store %arg7[%c0_11, %c0_12], %18 {strides = array<i32>} : memref<64x128xf32, #tpu.memory_space<vmem>>, vector<64x128xf32>,
    return
  }
  func.func @transform_0(%arg0: i32) -> (i32, i32) {
    %c0_i32 = arith.constant 0 : i32
    %c0_i32_0 = arith.constant 0 : i32
    return %arg0, %c0_i32 : i32, i32
  }
  func.func @transform_1(%arg0: i32) -> (i32, i32) {
    %c0_i32 = arith.constant 0 : i32
    %c0_i32_0 = arith.constant 0 : i32
    %c0_i32_1 = arith.constant 0 : i32
    return %c0_i32, %c0_i32_0 : i32, i32
  }
  func.func @transform_2(%arg0: i32) -> (i32, i32) {
    %c0_i32 = arith.constant 0 : i32
    %c0_i32_0 = arith.constant 0 : i32
    %c0_i32_1 = arith.constant 0 : i32
    return %c0_i32, %c0_i32_0 : i32, i32
  }
  func.func @transform_3(%arg0: i32) -> (i32, i32) {
    %c0_i32 = arith.constant 0 : i32
    %c0_i32_0 = arith.constant 0 : i32
    return %arg0, %c0_i32 : i32, i32
  }
  func.func @transform_4(%arg0: i32) -> (i32, i32) {
    %c0_i32 = arith.constant 0 : i32
    %c0_i32_0 = arith.constant 0 : i32
    %c0_i32_1 = arith.constant 0 : i32
    return %c0_i32, %c0_i32_0 : i32, i32
  }
  func.func @transform_5(%arg0: i32) -> (i32, i32) {
    %c0_i32 = arith.constant 0 : i32
    %c0_i32_0 = arith.constant 0 : i32
    %c0_i32_1 = arith.constant 0 : i32
    return %c0_i32, %c0_i32_0 : i32, i32
  }
  func.func @transform_6(%arg0: i32) -> (i32, i32) {
    %c0_i32 = arith.constant 0 : i32
    %c0_i32_0 = arith.constant 0 : i32
    return %arg0, %c0_i32 : i32, i32
  }
}

</mosaic_0001>

<bundles_post_ra>
// kernel: resnet_bloc_forward.6
= control target key start
LH: loop header
LB: loop body
LE: loop exit
PB: predicated region body
PF: predicated region fallthrough
CT: control target
= control target key end

     0   :  { %s431_s12 = smov 0   ;;  %s461_s0 = inlined_call_operand.vmem [shape: bf16[128,128], index: 0, kind: input, shape index: {}]   ;;  %s462_s1 = inlined_call_operand.vmem [shape: f32[1,128], index: 1, kind: input, shape index: {}]   ;;  %s463_s2 = inlined_call_operand.vmem [shape: f32[1,128], index: 2, kind: input, shape index: {}]   ;;  %s464_s3 = inlined_call_operand.vmem [shape: bf16[128,128], index: 3, kind: output, shape index: {}]  }
   0x1 LB: > { %s324_s13 = sadd.s32 4294967295, %s409_s12   ;;  %p328_p0 = scmp.ge.s32.totalorder %s409_s12, 1  ;;  %s409_s12 = sphi %s431_s12, %s13_s12  }
   0x2   : > { %p138_p1 = scmp.lt.s32.totalorder %s409_s12, 3 }
   0x4   : > { %p139_p2 = pnand %p328_p0, %p138_p1 }
   0x5   : > { %s329_s14 = sshll.u32 (!%p139_p2), %s324_s13, 3  ;;  %v333_v0 = vld [vmem:[%s462_s1] ss:$0 sm:$0xff] (!%p139_p2) }
   0x6   : > { %142 = sbr.rel (%p139_p2) target bundleno = 29 (0x1d), region = 32  ;;  %p163_p3 = scmp.lt.s32.totalorder (!%p139_p2), %s329_s14, 15  ;;  %v334_v9 = vld [vmem:[%s463_s2] ss:$0 sm:$0xff] (!%p139_p2) }
   0xd   : > { %s466_s14 = smov (!%p163_p3, %s329_s14), 15 }
   0xe   : > { %s330_s15 = sshll.u32 %s466_s14, 2 }
   0xf   : > { %s166_s18 = scalar_lea.vmem %s461_s0, %s330_s15  ;;  %s172_s25 = scalar_lea.vmem %s464_s3, %s330_s15 }
  0x10   : > { %v354_v1 = vld [vmem:[%s166_s18] sm:$0xff]   ;;  %v389_v2 = vld [vmem:[%s166_s18 + $0x8] sm:$0xff]   ;;  %v390_v3 = vld [vmem:[%s166_s18 + $0x10] sm:$0xff]  }
  0x11   : > { %v355_v4 = vunpack.c.l.bf16 %v354_v1  ;;  %v356_v5 = vunpack.c.h.bf16 %v354_v1  ;;  %v359_v6 = vunpack.c.l.bf16 %v389_v2  ;;  %v360_v7 = vunpack.c.h.bf16 %v389_v2  ;;  %v391_v8 = vld [vmem:[%s166_s18 + $0x18] sm:$0xff]  }
  0x12   : > { %v363_v10 = vunpack.c.l.bf16 %v390_v3  ;;  %v364_v11 = vunpack.c.h.bf16 %v390_v3  ;;  %v367_v12 = vunpack.c.l.bf16 %v391_v8  ;;  %v368_v13 = vunpack.c.h.bf16 %v391_v8 }
  0x13   : > { %v197_v14 = vmul.f32 %v355_v4, %v333_v0  ;;  %v198_v15 = vmul.f32 %v356_v5, %v333_v0  ;;  %v199_v16 = vmul.f32 %v359_v6, %v333_v0  ;;  %v200_v17 = vmul.f32 %v360_v7, %v333_v0 }
  0x14   : > { %v201_v18 = vmul.f32 %v363_v10, %v333_v0  ;;  %v202_v19 = vmul.f32 %v364_v11, %v333_v0  ;;  %v203_v20 = vmul.f32 %v367_v12, %v333_v0  ;;  %v204_v21 = vmul.f32 %v368_v13, %v333_v0 }
  0x15   : > { %v212_v22 = vadd.f32 %v334_v9, %v197_v14  ;;  %v213_v23 = vadd.f32 %v334_v9, %v198_v15  ;;  %v214_v24 = vadd.f32 %v334_v9, %v199_v16  ;;  %v215_v25 = vadd.f32 %v334_v9, %v200_v17 }
  0x16   : > { %v216_v26 = vadd.f32 %v334_v9, %v201_v18  ;;  %v217_v27 = vadd.f32 %v334_v9, %v202_v19  ;;  %v218_v28 = vadd.f32 %v334_v9, %v203_v20  ;;  %v219_v29 = vadd.f32 %v334_v9, %v204_v21 }
  0x17   : > { %v220_v30 = vmax.f32 %v212_v22, 0.0  ;;  %v221_v31 = vmax.f32 %v213_v23, 0.0  ;;  %v222_v32 = vmax.f32 %v214_v24, 0.0  ;;  %v223_v33 = vmax.f32 %v215_v25, 0.0 }
  0x18   : > { %v224_v34 = vmax.f32 %v216_v26, 0.0  ;;  %v225_v35 = vmax.f32 %v217_v27, 0.0  ;;  %v226_v36 = vmax.f32 %v218_v28, 0.0  ;;  %v227_v37 = vmax.f32 %v219_v29, 0.0 }
  0x19   : > { %v372_v38 = vpack.c.bf16 %v221_v31, %v220_v30  ;;  %v377_v39 = vpack.c.bf16 %v223_v33, %v222_v32 }
  0x1a   : > { %v382_v40 = vpack.c.bf16 %v225_v35, %v224_v34  ;;  %v387_v41 = vpack.c.bf16 %v227_v37, %v226_v36 }
  0x1b   : > { %373 = vst [vmem:[%s172_s25] sm:$0xff] %v372_v38   ;;  %392 = vst [vmem:[%s172_s25 + $0x8] sm:$0xff] %v377_v39  }
  0x1c   : > { %393 = vst [vmem:[%s172_s25 + $0x10] sm:$0xff] %v382_v40   ;;  %394 = vst [vmem:[%s172_s25 + $0x18] sm:$0xff] %v387_v41  }
  0x1d PF: > { %s13_s12 = sadd.s32 1, %s409_s12  }
  0x1e   : > { %p10_p4 = scmp.ge.s32.totalorder %s13_s12, 4  }
  0x20   :  { %12 = sbr.rel (!%p10_p4) target bundleno = 1 (0x1), region = 62 }

// kernel: resnet_bloc_forward.5
= control target key start
LH: loop header
LB: loop body
LE: loop exit
PB: predicated region body
PF: predicated region fallthrough
CT: control target
= control target key end

     0   :  { %s674_s12 = smov 0   ;;  %s736_s0 = inlined_call_operand.vmem [shape: bf16[128,128], index: 0, kind: input, shape index: {}]   ;;  %s737_s1 = inlined_call_operand.vmem [shape: bf16[128,128], index: 1, kind: input, shape index: {}]   ;;  %s738_s2 = inlined_call_operand.vmem [shape: bf16[128,128], index: 2, kind: output, shape index: {0}]   ;;  %s739_s3 = inlined_call_operand.vmem [shape: f32[2,2,128], index: 3, kind: output, shape index: {1}]  }
   0x1 LB: > { %s680_s13 = sadd.s32 4294967295, %s652_s12   ;;  %p515_p0 = scmp.ge.s32.totalorder %s652_s12, 1  ;;  %s652_s12 = sphi %s674_s12, %s14_s12  }
   0x2   : > { %p141_p1 = scmp.lt.s32.totalorder %s652_s12, 3 }
   0x4   : > { %p142_p2 = pnand %p515_p0, %p141_p1 }
   0x5   : > { %v634_v0 = vld [vmem:[%s737_s1] sm:$0xff] (!%p142_p2)   ;;  %s516_s16 = sshll.u32 (!%p142_p2), %s680_s13, 3  ;;  %v635_v1 = vld [vmem:[%s737_s1 + $0x8] sm:$0xff] (!%p142_p2)   ;;  %v636_v2 = vld [vmem:[%s737_s1 + $0x10] sm:$0xff] (!%p142_p2)   ;;  %p181_p4 = scmp.lt.s32.totalorder (!%p142_p2), %s680_s13, 1  ;;  %vm421_vm0 = vcmask (!%p142_p2), 1040384  }
   0x6   : > { %145 = sbr.rel (%p142_p2) target bundleno = 283 (0x11b), region = 28  ;;  %p170_p3 = scmp.lt.s32.totalorder (!%p142_p2), %s516_s16, 15  ;;  %586 = vmatprep.subr.bf16.mxu0 (!%p142_p2), %v634_v0  ;;  %610 = vmatprep.subr.bf16.mxu1 (!%p142_p2), %v634_v0  ;;  %v637_v3 = vld [vmem:[%s737_s1 + $0x18] sm:$0xff] (!%p142_p2)   ;;  %v638_v6 = vld [vmem:[%s737_s1 + $0x20] sm:$0xff] (!%p142_p2)   ;;  %v639_v7 = vld [vmem:[%s737_s1 + $0x28] sm:$0xff] (!%p142_p2)  }
   0x7   : > { %587 = vmatpush3.bf16.msra.mxu0 (!%p142_p2), %v634_v0  ;;  %618 = vmatpush3.bf16.msra.mxu1 (!%p142_p2), %v634_v0  ;;  %v640_v8 = vld [vmem:[%s737_s1 + $0x30] sm:$0xff] (!%p142_p2)   ;;  %v641_v9 = vld [vmem:[%s737_s1 + $0x38] sm:$0xff] (!%p142_p2)  }
   0x8   : > { %588 = vmatprep.subr.bf16.mxu0 (!%p142_p2), %v635_v1  ;;  %611 = vmatprep.subr.bf16.mxu1 (!%p142_p2), %v635_v1 }
   0xb   : > { %589 = vmatpush3.bf16.msra.mxu0 (!%p142_p2), %v635_v1  ;;  %619 = vmatpush3.bf16.msra.mxu1 (!%p142_p2), %v635_v1 }
   0xc   : > { %590 = vmatprep.subr.bf16.mxu0 (!%p142_p2), %v636_v2  ;;  %612 = vmatprep.subr.bf16.mxu1 (!%p142_p2), %v636_v2 }
   0xd   : > { %s741_s16 = smov (!%p170_p3, %s516_s16), 15  ;;  %s743_s13 = smov (!%p181_p4, %s680_s13), 1 }
   0xe   : > { %s517_s21 = sshll.u32 %s741_s16, 2  ;;  %s520_s11 = sshll.u32 %s743_s13, 1 }
   0xf   : > { %s702_s24 = scalar_lea.vmem %s736_s0, %s517_s21  ;;  %591 = vmatpush3.bf16.msra.mxu0 %v636_v2  ;;  %620 = vmatpush3.bf16.msra.mxu1 %v636_v2  ;;  %s179_s10 = scalar_lea.vmem %s738_s2, %s517_s21 }
  0x10   : > { %v642_v4 = vld [vmem:[%s702_s24] sm:$0xff]   ;;  %v644_v5 = vld [vmem:[%s702_s24 + $0x10] sm:$0xff]   ;;  %592 = vmatprep.subr.bf16.mxu0 %v637_v3  ;;  %613 = vmatprep.subr.bf16.mxu1 %v637_v3  ;;  %v643_v10 = vld [vmem:[%s702_s24 + $0x8] sm:$0xff]   ;;  %s184_s16 = scalar_lea.vmem %s739_s3, %s520_s11 }
  0x11   : > { %602 = vmatprep.mubr.bf16.mxu0 %v642_v4  ;;  %606 = vmatprep.mubr.bf16.mxu1 %v644_v5  ;;  %v645_v11 = vld [vmem:[%s702_s24 + $0x18] sm:$0xff]  }
  0x13   : > { %593 = vmatpush3.bf16.msra.mxu0 %v637_v3  ;;  %621 = vmatpush3.bf16.msra.mxu1 %v637_v3 }
  0x14   : > { %594 = vmatprep.subr.bf16.mxu0 %v638_v6  ;;  %614 = vmatprep.subr.bf16.mxu1 %v638_v6 }
  0x17   : > { %595 = vmatpush3.bf16.msra.mxu0 %v638_v6  ;;  %622 = vmatpush3.bf16.msra.mxu1 %v638_v6 }
  0x18   : > { %596 = vmatprep.subr.bf16.mxu0 %v639_v7  ;;  %615 = vmatprep.subr.bf16.mxu1 %v639_v7 }
  0x1b   : > { %597 = vmatpush3.bf16.msra.mxu0 %v639_v7  ;;  %623 = vmatpush3.bf16.msra.mxu1 %v639_v7 }
  0x1c   : > { %598 = vmatprep.subr.bf16.mxu0 %v640_v8  ;;  %616 = vmatprep.subr.bf16.mxu1 %v640_v8 }
  0x1f   : > { %599 = vmatpush3.bf16.msra.mxu0 %v640_v8  ;;  %624 = vmatpush3.bf16.msra.mxu1 %v640_v8 }
  0x20   : > { %600 = vmatprep.subr.bf16.mxu0 %v641_v9  ;;  %617 = vmatprep.subr.bf16.mxu1 %v641_v9 }
  0x23   : > { %601 = vmatpush3.bf16.msra.mxu0 %v641_v9  ;;  %625 = vmatpush3.bf16.msra.mxu1 %v641_v9 }
  0x26   : > { %603 = vmatmul.mubr.bf16.vlgmr.msra.gmra.mrb[0].mxu0 %v643_v10  ;;  %607 = vmatmul.mubr.bf16.vlgmr.msra.gmra.mrb[0].mxu1 %v645_v11 }
  0xf9   : > { %v604_v12 = vpop.f32.mrb[0].mxu0  ;;  %v608_v13 = vpop.f32.mrb[0].mxu1 }
  0xfa   : > { %v316_v14 = vpop.f32.mrb[1].mxu0  ;;  %v332_v15 = vpop.f32.mrb[1].mxu1  ;;  %v402_v27 = vmul.f32 %v604_v12, %v604_v12  ;;  %v406_v39 = vmul.f32 %v608_v13, %v608_v13 }
  0xfb   : > { %v605_v16 = vpop.f32.mrb[2].mxu0  ;;  %v609_v17 = vpop.f32.mrb[2].mxu1  ;;  %v400_v18 = vmul.f32 %v316_v14, %v316_v14  ;;  %v404_v33 = vmul.f32 %v332_v15, %v332_v15 }
  0xfc   : > { %v559_v19 = vpack.c.bf16 %v605_v16, %v604_v12  ;;  %v319_v20 = vpop.f32.mrb[3].mxu0  ;;  %v569_v21 = vpack.c.bf16 %v609_v17, %v608_v13  ;;  %v335_v22 = vpop.f32.mrb[3].mxu1  ;;  %v403_v30 = vmul.f32 %v605_v16, %v605_v16  ;;  %v407_v42 = vmul.f32 %v609_v17, %v609_v17 }
  0xfd   : > { %v554_v23 = vpack.c.bf16 %v319_v20, %v316_v14  ;;  %v387_v24 = vadd.f32 %v319_v20, %v316_v14  ;;  %v401_v25 = vmul.f32 %v319_v20, %v319_v20  ;;  %v564_v26 = vpack.c.bf16 %v335_v22, %v332_v15 }
  0xfe   : > { %571 = vst [vmem:[%s179_s10 + $0x8] sm:$0xff] %v559_v19   ;;  %573 = vst [vmem:[%s179_s10 + $0x18] sm:$0xff] %v569_v21   ;;  %v405_v38 = vmul.f32 %v335_v22, %v335_v22 }
  0xff   : > { %555 = vst [vmem:[%s179_s10] sm:$0xff] %v554_v23   ;;  %v388_v28 = vadd.f32 %v604_v12, %v387_v24  ;;  %v408_v29 = vadd.f32 %v401_v25, %v400_v18  ;;  %572 = vst [vmem:[%s179_s10 + $0x10] sm:$0xff] %v564_v26  }
 0x101   : > { %v409_v31 = vadd.f32 %v408_v29, %v402_v27  ;;  %v389_v32 = vadd.f32 %v605_v16, %v388_v28 }
 0x103   : > { %v390_v34 = vadd.f32 %v389_v32, %v332_v15  ;;  %v410_v35 = vadd.f32 %v409_v31, %v403_v30 }
 0x105   : > { %v411_v36 = vadd.f32 %v410_v35, %v404_v33  ;;  %v391_v37 = vadd.f32 %v390_v34, %v335_v22 }
 0x107   : > { %v392_v40 = vadd.f32 %v608_v13, %v391_v37  ;;  %v412_v41 = vadd.f32 %v411_v36, %v405_v38 }
 0x109   : > { %v393_v43 = vadd.f32 %v609_v17, %v392_v40  ;;  %v413_v44 = vadd.f32 %v412_v41, %v406_v39 }
 0x10b   : > { %v394_v45 = vrot.slane %v393_v43, 4  ;;  %v414_v46 = vadd.f32 %v413_v44, %v407_v42 }
 0x10d   : > { %v395_v47 = vadd.f32 %v394_v45, %v393_v43  ;;  %v415_v48 = vrot.slane %v414_v46, 4 }
 0x10f   : > { %v396_v49 = vrot.slane %v395_v47, 2  ;;  %v416_v50 = vadd.f32 %v415_v48, %v414_v46 }
 0x111   : > { %v397_v51 = vadd.f32 %v396_v49, %v395_v47  ;;  %v417_v52 = vrot.slane %v416_v50, 2 }
 0x113   : > { %v398_v53 = vrot.slane %v397_v51, 1  ;;  %v418_v54 = vadd.f32 %v417_v52, %v416_v50 }
 0x115   : > { %v419_v55 = vrot.slane %v418_v54, 1  ;;  %v399_v56 = vadd.f32 %v398_v53, %v397_v51 }
 0x117   : > { %v420_v57 = vadd.f32 %v419_v55, %v418_v54 }
 0x119   : > { %v422_v58 = vsel %vm421_vm0, %v399_v56, %v420_v57 }
 0x11a   : > { %423 = vst [vmem:[%s184_s16] sm:$0x3] %v422_v58 }
 0x11b PF: > { %s14_s12 = sadd.s32 1, %s652_s12  }
 0x11c   : > { %p11_p5 = scmp.ge.s32.totalorder %s14_s12, 4  }
 0x11e   :  { %13 = sbr.rel (!%p11_p5) target bundleno = 1 (0x1), region = 70 }

// kernel: resnet_bloc_forward.9
= control target key start
LH: loop header
LB: loop body
LE: loop exit
PB: predicated region body
PF: predicated region fallthrough
CT: control target
= control target key end

     0   :  { %s567_s21 = smov 0   ;;  %s665_s0 = inlined_call_operand.vmem [shape: bf16[128,128], index: 0, kind: input, shape index: {}]   ;;  %s666_s1 = inlined_call_operand.vmem [shape: f32[1,128], index: 1, kind: input, shape index: {}]   ;;  %s667_s2 = inlined_call_operand.vmem [shape: f32[1,128], index: 2, kind: input, shape index: {}]   ;;  %s668_s3 = inlined_call_operand.vmem [shape: bf16[128,128], index: 3, kind: input, shape index: {}]   ;;  %s669_s4 = inlined_call_operand.vmem [shape: f32[1,128], index: 4, kind: input, shape index: {}]   ;;  %s670_s5 = inlined_call_operand.vmem [shape: f32[1,128], index: 5, kind: input, shape index: {}]   ;;  %s671_s6 = inlined_call_operand.vmem [shape: f32[128,128], index: 6, kind: output, shape index: {}]  }
   0x1 LB: > { %s461_s22 = sadd.s32 4294967295, %s530_s21   ;;  %p465_p0 = scmp.ge.s32.totalorder %s530_s21, 1  ;;  %s530_s21 = sphi %s567_s21, %s16_s21  }
   0x2   : > { %p224_p1 = scmp.lt.s32.totalorder %s530_s21, 3 }
   0x4   : > { %p225_p2 = pnand %p465_p0, %p224_p1 }
   0x5   : > { %s466_s23 = sshll.u32 (!%p225_p2), %s461_s22, 3  ;;  %v591_v0 = vld [vmem:[%s666_s1] ss:$0 sm:$0xff] (!%p225_p2) }
   0x6   : > { %228 = sbr.rel (%p225_p2) target bundleno = 39 (0x27), region = 44  ;;  %p260_p3 = scmp.lt.s32.totalorder (!%p225_p2), %s466_s23, 15  ;;  %v596_v1 = vld [vmem:[%s669_s4] ss:$0 sm:$0xff] (!%p225_p2) }
   0x7   : > { %v605_v10 = vld [vmem:[%s667_s2] ss:$0 sm:$0xff] (!%p225_p2) }
   0x8   : > { %v610_v11 = vld [vmem:[%s670_s5] ss:$0 sm:$0xff] (!%p225_p2) }
   0xd   : > { %s673_s23 = smov (!%p260_p3, %s466_s23), 15 }
   0xe   : > { %s467_s24 = sshll.u32 %s673_s23, 2  ;;  %s471_s15 = sshll.u32 %s673_s23, 3 }
   0xf   : > { %s581_s27 = scalar_lea.vmem %s665_s0, %s467_s24  ;;  %s586_s30 = scalar_lea.vmem %s668_s3, %s467_s24 }
  0x10   : > { %v479_v2 = vld [vmem:[%s581_s27] sm:$0xff]   ;;  %v510_v4 = vld [vmem:[%s581_s27 + $0x8] sm:$0xff]   ;;  %v511_v24 = vld [vmem:[%s581_s27 + $0x10] sm:$0xff]   ;;  %s634_s18 = scalar_lea.vmem %s671_s6, %s471_s15 }
  0x11   : > { %v495_v3 = vld [vmem:[%s586_s30] sm:$0xff]   ;;  %v480_v5 = vunpack.c.l.bf16 %v479_v2  ;;  %v481_v7 = vunpack.c.h.bf16 %v479_v2  ;;  %v513_v9 = vld [vmem:[%s586_s30 + $0x8] sm:$0xff]   ;;  %v484_v12 = vunpack.c.l.bf16 %v510_v4  ;;  %v485_v14 = vunpack.c.h.bf16 %v510_v4  ;;  %v514_v25 = vld [vmem:[%s586_s30 + $0x10] sm:$0xff]  }
  0x12   : > { %v496_v6 = vunpack.c.l.bf16 %v495_v3  ;;  %v497_v8 = vunpack.c.h.bf16 %v495_v3  ;;  %v500_v13 = vunpack.c.l.bf16 %v513_v9  ;;  %v501_v15 = vunpack.c.h.bf16 %v513_v9  ;;  %v512_v42 = vld [vmem:[%s581_s27 + $0x18] sm:$0xff]  }
  0x13   : > { %v300_v16 = vmul.f32 %v480_v5, %v591_v0  ;;  %v301_v18 = vmul.f32 %v481_v7, %v591_v0  ;;  %v302_v20 = vmul.f32 %v484_v12, %v591_v0  ;;  %v303_v22 = vmul.f32 %v485_v14, %v591_v0  ;;  %v515_v43 = vld [vmem:[%s586_s30 + $0x18] sm:$0xff]  }
  0x14   : > { %v346_v17 = vmul.f32 %v496_v6, %v596_v1  ;;  %v347_v19 = vmul.f32 %v497_v8, %v596_v1  ;;  %v348_v21 = vmul.f32 %v500_v13, %v596_v1  ;;  %v349_v23 = vmul.f32 %v501_v15, %v596_v1 }
  0x15   : > { %v315_v26 = vadd.f32 %v605_v10, %v300_v16  ;;  %v316_v28 = vadd.f32 %v605_v10, %v301_v18  ;;  %v317_v30 = vadd.f32 %v605_v10, %v302_v20  ;;  %v318_v32 = vadd.f32 %v605_v10, %v303_v22 }
  0x16   : > { %v361_v27 = vadd.f32 %v610_v11, %v346_v17  ;;  %v362_v29 = vadd.f32 %v610_v11, %v347_v19  ;;  %v363_v31 = vadd.f32 %v610_v11, %v348_v21  ;;  %v364_v33 = vadd.f32 %v610_v11, %v349_v23 }
  0x17   : > { %v488_v36 = vunpack.c.l.bf16 %v511_v24  ;;  %v504_v37 = vunpack.c.l.bf16 %v514_v25  ;;  %v489_v40 = vunpack.c.h.bf16 %v511_v24  ;;  %v505_v41 = vunpack.c.h.bf16 %v514_v25 }
  0x18   : > { %v369_v34 = vadd.f32 %v361_v27, %v315_v26  ;;  %v370_v35 = vadd.f32 %v362_v29, %v316_v28  ;;  %v371_v38 = vadd.f32 %v363_v31, %v317_v30  ;;  %v372_v39 = vadd.f32 %v364_v33, %v318_v32 }
  0x19   : > { %v304_v46 = vmul.f32 %v488_v36, %v591_v0  ;;  %v350_v47 = vmul.f32 %v504_v37, %v596_v1  ;;  %v305_v50 = vmul.f32 %v489_v40, %v591_v0  ;;  %v351_v51 = vmul.f32 %v505_v41, %v596_v1 }
  0x1a   : > { %v377_v44 = vmax.f32 %v369_v34, 0.0  ;;  %v378_v45 = vmax.f32 %v370_v35, 0.0  ;;  %v379_v48 = vmax.f32 %v371_v38, 0.0  ;;  %v380_v49 = vmax.f32 %v372_v39, 0.0 }
  0x1b   : > { %v319_v52 = vadd.f32 %v605_v10, %v304_v46  ;;  %v365_v53 = vadd.f32 %v610_v11, %v350_v47  ;;  %v492_v54 = vunpack.c.l.bf16 %v512_v42  ;;  %v508_v55 = vunpack.c.l.bf16 %v515_v43 }
  0x1c   : > { %385 = vst [vmem:[%s634_s18] sm:$0xff] %v377_v44  ;;  %386 = vst [vmem:[%s634_s18 + $0x8] sm:$0xff] %v378_v45  ;;  %v320_v56 = vadd.f32 %v605_v10, %v305_v50  ;;  %v366_v57 = vadd.f32 %v610_v11, %v351_v51  ;;  %v493_v58 = vunpack.c.h.bf16 %v512_v42  ;;  %v509_v59 = vunpack.c.h.bf16 %v515_v43 }
  0x1d   : > { %387 = vst [vmem:[%s634_s18 + $0x10] sm:$0xff] %v379_v48  ;;  %388 = vst [vmem:[%s634_s18 + $0x18] sm:$0xff] %v380_v49  ;;  %v373_v60 = vadd.f32 %v365_v53, %v319_v52  ;;  %v306_v61 = vmul.f32 %v492_v54, %v591_v0  ;;  %v352_v62 = vmul.f32 %v508_v55, %v596_v1 }
  0x1e   : > { %v374_v63 = vadd.f32 %v366_v57, %v320_v56  ;;  %v307_v2 = vmul.f32 %v493_v58, %v591_v0  ;;  %v353_v3 = vmul.f32 %v509_v59, %v596_v1 }
  0x1f   : > { %v381_v4 = vmax.f32 %v373_v60, 0.0  ;;  %v321_v5 = vadd.f32 %v605_v10, %v306_v61  ;;  %v367_v6 = vadd.f32 %v610_v11, %v352_v62 }
  0x20   : > { %v382_v7 = vmax.f32 %v374_v63, 0.0  ;;  %v322_v8 = vadd.f32 %v605_v10, %v307_v2  ;;  %v368_v9 = vadd.f32 %v610_v11, %v353_v3 }
  0x21   : > { %389 = vst [vmem:[%s634_s18 + $0x20] sm:$0xff] %v381_v4  ;;  %v375_v12 = vadd.f32 %v367_v6, %v321_v5 }
  0x22   : > { %390 = vst [vmem:[%s634_s18 + $0x28] sm:$0xff] %v382_v7  ;;  %v376_v13 = vadd.f32 %v368_v9, %v322_v8 }
  0x23   : > { %v383_v14 = vmax.f32 %v375_v12, 0.0 }
  0x24   : > { %v384_v15 = vmax.f32 %v376_v13, 0.0 }
  0x25   : > { %391 = vst [vmem:[%s634_s18 + $0x30] sm:$0xff] %v383_v14 }
  0x26   : > { %392 = vst [vmem:[%s634_s18 + $0x38] sm:$0xff] %v384_v15 }
  0x27 PF: > { %s16_s21 = sadd.s32 1, %s530_s21  }
  0x28   : > { %p13_p4 = scmp.ge.s32.totalorder %s16_s21, 4  }
  0x2a   :  { %15 = sbr.rel (!%p13_p4) target bundleno = 1 (0x1), region = 77 }

</bundles_post_ra>
